<compile_context>
chip_gen: v5e
topology: v5e:2x2
jax: 0.10.0
libtpu: 0.0.40
codegen_flags: <defaults>
</compile_context>

<pallas_src>
import jax
import jax.numpy as jnp
from jax.experimental import pallas as pl
from jax.experimental.pallas import tpu as pltpu


def _round_up(n, m):
    return ((n + m - 1) // m) * m


def _vmem_limit_bytes(buffered_bytes):
    # Derive the scoped-VMEM request from the actual buffered block bytes
    # (plus headroom for compiler-internal scratch); cap well below v7x's
    # 64 MiB physical VMEM.
    return int(min(48 * 1024 * 1024,
                   max(8 * 1024 * 1024, 2 * int(buffered_bytes) + (2 << 20))))


# ----------------------------------------------------------------------------
# Single-step GRU cell kernel (the module's actual forward: seq_len == 1).
# ----------------------------------------------------------------------------
def _gru_cell_kernel(x_ref, h_ref, wih_ref, whh_ref, bi_ref, bhn_ref, hout_ref):
    Hp = h_ref.shape[-1]
    gi = jnp.dot(x_ref[...], wih_ref[...],
                 preferred_element_type=jnp.float32) + bi_ref[...]
    gh = jnp.dot(h_ref[...], whh_ref[...], preferred_element_type=jnp.float32)
    r = jax.nn.sigmoid(gi[:, 0 * Hp:1 * Hp] + gh[:, 0 * Hp:1 * Hp])
    z = jax.nn.sigmoid(gi[:, 1 * Hp:2 * Hp] + gh[:, 1 * Hp:2 * Hp])
    n = jnp.tanh(gi[:, 2 * Hp:3 * Hp] + r * (gh[:, 2 * Hp:3 * Hp] + bhn_ref[...]))
    hout_ref[...] = ((1.0 - z) * n + z * h_ref[...]).astype(hout_ref.dtype)


def gru_step_pallas(xp, hp, wih_t, whh_t, bias_i, bias_hn):
    """xp: (Bp, Ip) f32, hp: (Bp, Hp) f32. Returns new hidden (Bp, Hp) f32."""
    Bp, Hp = hp.shape
    vmem = pl.BlockSpec(memory_space=pltpu.MemorySpace.VMEM)
    buffered = (xp.size * 4 + hp.size * 4 + wih_t.size * 4 + whh_t.size * 4 +
                bias_i.size * 4 + bias_hn.size * 4 + Bp * Hp * 4)
    return pl.pallas_call(
        _gru_cell_kernel,
        out_shape=jax.ShapeDtypeStruct((Bp, Hp), jnp.float32),
        in_specs=[vmem] * 6,
        out_specs=vmem,
        compiler_params=pltpu.CompilerParams(
            vmem_limit_bytes=_vmem_limit_bytes(buffered)),
    )(xp, hp, wih_t, whh_t, bias_i, bias_hn)


# ----------------------------------------------------------------------------
# Fused, time-chunked decode loop kernel.
#   gi (input projection + bias) is precomputed for all steps and laid out as
#   (Bp, Tp*3Hp): per-step access is a static, lane-aligned slice (offsets are
#   multiples of 128), so no relayouts and no wrapper transposes are needed.
#   The hidden state is carried in the resident final-hidden output block.
# ----------------------------------------------------------------------------
def _make_decode_kernel(Tc, Hp, T_total, Tp):
    Np = 3 * Hp

    def kernel(gi_ref, h0_ref, whh_ref, bhn_ref, outs_ref, hfin_ref):
        c = pl.program_id(1)   # time-chunk index (innermost, "arbitrary")

        @pl.when(c == 0)
        def _():
            # Output blocks are never pre-loaded from HBM, so the carry must be
            # seeded from the (tiny, resident) h0 input block here.
            hfin_ref[...] = h0_ref[...]

        h = hfin_ref[...]
        bhn = bhn_ref[...]
        # Static unroll over the time chunk: every gi / outs access below is a
        # static lane slice. W_hh is re-read from VMEM per step (cheap) rather
        # than hoisted, to keep vreg pressure low across the unrolled loop.
        for t in range(Tc):
            gi = gi_ref[:, t * Np:(t + 1) * Np]
            gh = jnp.dot(h, whh_ref[...], preferred_element_type=jnp.float32)
            r = jax.nn.sigmoid(gi[:, 0 * Hp:1 * Hp] + gh[:, 0 * Hp:1 * Hp])
            z = jax.nn.sigmoid(gi[:, 1 * Hp:2 * Hp] + gh[:, 1 * Hp:2 * Hp])
            n = jnp.tanh(gi[:, 2 * Hp:3 * Hp] + r * (gh[:, 2 * Hp:3 * Hp] + bhn))
            h_new = (1.0 - z) * n + z * h
            if Tp != T_total:
                # Padded tail steps must not corrupt the carried hidden state.
                h_new = jnp.where((c * Tc + t) < T_total, h_new, h)
            outs_ref[:, t * Hp:(t + 1) * Hp] = h_new.astype(outs_ref.dtype)
            h = h_new
        hfin_ref[...] = h

    return kernel


def gru_decode_pallas(gi_flat, h0_p, whh_t, bias_hn, *, seq_len, time_chunk,
                      out_dtype=jnp.float32, batch_tile=None):
    """gi_flat: (Bp, Tp*3Hp) f32 precomputed input projections (+ folded bias),
    h0_p: (Bp, Hp) f32. Returns (outs (Bp, Tp*Hp) out_dtype, h_final (Bp, Hp) f32)."""
    Bp = gi_flat.shape[0]
    Hp = h0_p.shape[-1]
    Np = 3 * Hp
    Tp = gi_flat.shape[1] // Np
    Tc = int(time_chunk)
    assert Tp % Tc == 0
    nc = Tp // Tc

    Bt = Bp if batch_tile is None else int(batch_tile)
    assert Bp % Bt == 0
    nb = Bp // Bt

    kernel = _make_decode_kernel(Tc, Hp, int(seq_len), Tp)

    in_specs = [
        pl.BlockSpec((Bt, Tc * Np), lambda b, c: (b, c)),   # gi chunk
        pl.BlockSpec((Bt, Hp), lambda b, c: (b, 0)),        # h0 (resident per b)
        pl.BlockSpec((Hp, Np), lambda b, c: (0, 0)),        # W_hh^T (resident)
        pl.BlockSpec((1, Hp), lambda b, c: (0, 0)),         # b_hn   (resident)
    ]
    out_specs = (
        pl.BlockSpec((Bt, Tc * Hp), lambda b, c: (b, c)),   # outs chunk
        pl.BlockSpec((Bt, Hp), lambda b, c: (b, 0)),        # hidden carry / final
    )
    out_shape = (jax.ShapeDtypeStruct((Bp, Tp * Hp), out_dtype),
                 jax.ShapeDtypeStruct((Bp, Hp), jnp.float32))

    out_bytes = jnp.dtype(out_dtype).itemsize
    buffered = 2 * (Bt * Tc * Np * 4 + Bt * Tc * Hp * out_bytes +
                    2 * Bt * Hp * 4 + Hp * Np * 4 + Hp * 4)

    # NOTE: input_output_aliases(h0 -> h_final) was considered but skipped:
    # output blocks are never pre-loaded from HBM, so the h0 input block and
    # the c==0 seed copy are still required; the aliasing would only save a
    # ~KB-sized HBM buffer.
    return pl.pallas_call(
        kernel,
        grid=(nb, nc),
        in_specs=in_specs,
        out_specs=out_specs,
        out_shape=out_shape,
        compiler_params=pltpu.CompilerParams(
            dimension_semantics=("parallel", "arbitrary"),
            vmem_limit_bytes=_vmem_limit_bytes(buffered)),
    )(gi_flat, h0_p, whh_t, bias_hn)


# ----------------------------------------------------------------------------
# Module wrapper.
# ----------------------------------------------------------------------------
class DecoderPTRGRUPallas:
    """JAX/Pallas port of DecoderPTRGRU (nn.GRU, num_layers=1, batch_first=True)."""

    def __init__(self, input_feature_size, hidden_size, key, time_chunk=32):
        self.input_size = int(input_feature_size)
        self.hidden_size = int(hidden_size)
        # Time-chunk length for the fused decode loop (static unroll size).
        self.time_chunk = int(time_chunk)

        I, H = self.input_size, self.hidden_size
        Hp = _round_up(H, 128)   # lane-aligned gate slices + lane-dense stores
        Ip = _round_up(I, 8)     # sublane-aligned contraction dim
        self.Hp, self.Ip = Hp, Ip

        # PyTorch nn.GRU init: U(-1/sqrt(H), 1/sqrt(H)); shapes (3H,I),(3H,H),(3H,)
        k = 1.0 / (H ** 0.5)
        k1, k2, k3, k4 = jax.random.split(key, 4)
        self.w_ih = jax.random.uniform(k1, (3 * H, I), jnp.float32, -k, k)
        self.w_hh = jax.random.uniform(k2, (3 * H, H), jnp.float32, -k, k)
        self.b_ih = jax.random.uniform(k3, (3 * H,), jnp.float32, -k, k)
        self.b_hh = jax.random.uniform(k4, (3 * H,), jnp.float32, -k, k)

        # Pre-transposed, gate-padded weights (built once). Kept in f32: the
        # recurrence is overhead/DMA-bound, so f32 is free and keeps it exact.
        wih_t = jnp.zeros((Ip, 3 * Hp), jnp.float32)
        whh_t = jnp.zeros((Hp, 3 * Hp), jnp.float32)
        for g in range(3):
            wih_t = wih_t.at[:I, g * Hp:g * Hp + H].set(
                self.w_ih[g * H:(g + 1) * H, :].T)
            whh_t = whh_t.at[:H, g * Hp:g * Hp + H].set(
                self.w_hh[g * H:(g + 1) * H, :].T)
        # Fold b_ih + b_hh for r/z gates; keep b_hn separate (scaled by r).
        bias_i = jnp.zeros((1, 3 * Hp), jnp.float32)
        bias_i = bias_i.at[0, 0 * Hp:0 * Hp + H].set(self.b_ih[0:H] + self.b_hh[0:H])
        bias_i = bias_i.at[0, 1 * Hp:1 * Hp + H].set(
            self.b_ih[H:2 * H] + self.b_hh[H:2 * H])
        bias_i = bias_i.at[0, 2 * Hp:2 * Hp + H].set(self.b_ih[2 * H:3 * H])
        bias_hn = jnp.zeros((1, Hp), jnp.float32).at[0, :H].set(self.b_hh[2 * H:3 * H])

        self.wih_t = wih_t
        self.whh_t = whh_t
        self.bias_i = bias_i
        self.bias_hn = bias_hn

    # ---- padded-state helpers (callers may stay in padded space between steps)
    def pad_hidden(self, hidden, batch_pad=None):
        h2 = hidden.reshape(-1, self.hidden_size)
        B = h2.shape[0]
        Bp = _round_up(B, 8) if batch_pad is None else int(batch_pad)
        return jnp.zeros((Bp, self.Hp), jnp.float32).at[
            :B, :self.hidden_size].set(h2.astype(jnp.float32))

    def pad_x(self, x2d, batch_pad=None):
        B, I = x2d.shape
        Bp = _round_up(B, 8) if batch_pad is None else int(batch_pad)
        return jnp.zeros((Bp, self.Ip), jnp.float32).at[
            :B, :I].set(x2d.astype(jnp.float32))

    def step_padded(self, xp, hp):
        """Padded single step: xp (Bp, Ip) f32, hp (Bp, Hp) f32 -> (Bp, Hp) f32."""
        return gru_step_pallas(xp, hp, self.wih_t, self.whh_t,
                               self.bias_i, self.bias_hn)

    # ---- original module semantics -------------------------------------------
    def __call__(self, x, hidden):
        # x: (B, 1, I), hidden: (1, B, H) -> out (B, 1, H), hidden (1, B, H)
        assert x.shape[1] == 1
        B = x.shape[0]
        H = self.hidden_size
        xp = self.pad_x(x.reshape(B, -1))
        hp = self.pad_hidden(hidden)
        h_new = self.step_padded(xp, hp)[:B, :H]
        return h_new.reshape(B, 1, H), h_new.reshape(1, B, H)

    # ---- fused multi-step decode (weights resident, time-chunked grid) --------
    def decode(self, xs, hidden, out_dtype=jnp.float32):
        # xs: (B, T, I), hidden: (1, B, H) -> outs (B, T, H), hidden (1, B, H)
        B, T, I = xs.shape
        H, Hp, Ip = self.hidden_size, self.Hp, self.Ip
        Np = 3 * Hp
        Bp = _round_up(B, 8)
        Tc = min(self.time_chunk, T)
        Tp = _round_up(T, Tc)

        # Hoisted input projection: ONE MXU-efficient matmul over all T steps,
        # already in the (B, T, .) layout the kernel consumes (no transposes).
        xs_p = jnp.zeros((Bp, Tp, Ip), jnp.float32).at[:B, :T, :I].set(
            xs.astype(jnp.float32))
        gi_all = jnp.einsum('bti,ig->btg', xs_p, self.wih_t,
                            precision=jax.lax.Precision.HIGHEST) + self.bias_i
        gi_flat = gi_all.reshape(Bp, Tp * Np)
        h0_p = self.pad_hidden(hidden, batch_pad=Bp)

        # v7x: split the padded batch into 2 tiles ("parallel" axis -> 2 TCs)
        # when it is large enough; never split the gate/hidden axis (the
        # recurrence couples r/z/n every step).
        Bt = Bp // 2 if (Bp >= 16 and Bp % 16 == 0) else Bp

        outs_flat, hfin = gru_decode_pallas(
            gi_flat, h0_p, self.whh_t, self.bias_hn,
            seq_len=T, time_chunk=Tc, out_dtype=out_dtype, batch_tile=Bt)
        outs = outs_flat.reshape(Bp, Tp, Hp)[:B, :T, :H]
        return outs, hfin[:B, :H].reshape(1, B, H)


def _gru_reference_f32(x, hidden, w_ih, w_hh, b_ih, b_hh):
    """Pure-JAX f32 PyTorch nn.GRU single step (sanity reference)."""
    B = x.shape[0]
    H = w_hh.shape[1]
    xb = x.reshape(B, -1)
    hb = hidden.reshape(B, H)
    hi = jax.lax.Precision.HIGHEST
    gi = jnp.dot(xb, w_ih.T, precision=hi) + b_ih
    gh = jnp.dot(hb, w_hh.T, precision=hi) + b_hh
    r = jax.nn.sigmoid(gi[:, :H] + gh[:, :H])
    z = jax.nn.sigmoid(gi[:, H:2 * H] + gh[:, H:2 * H])
    n = jnp.tanh(gi[:, 2 * H:] + r * gh[:, 2 * H:])
    return (1.0 - z) * n + z * hb


if __name__ == "__main__":
    key = jax.random.PRNGKey(0)
    kp, kx, kh, ks = jax.random.split(key, 4)

    batch = 2
    input_feature_size = 4
    hidden_size = 32
    seq = 8

    # time_chunk=8 so the decode test below exercises multi-chunk carry + masking.
    model = DecoderPTRGRUPallas(input_feature_size, hidden_size, kp, time_chunk=8)

    x = jax.random.normal(kx, (batch, 1, input_feature_size), jnp.float32)
    hidden = jax.random.normal(kh, (1, batch, hidden_size), jnp.float32)

    # single-step forward (the module's spec)
    out, hidden_new = model(x, hidden)
    jax.block_until_ready((out, hidden_new))
    assert out.shape == (batch, 1, hidden_size)
    assert hidden_new.shape == (1, batch, hidden_size)

    # sanity check vs. pure-JAX f32 GRU math
    h_ref = _gru_reference_f32(x, hidden, model.w_ih, model.w_hh,
                               model.b_ih, model.b_hh)
    assert bool(jnp.allclose(out[:, 0, :], h_ref, atol=5e-3, rtol=1e-3))
    assert bool(jnp.allclose(hidden_new[0], h_ref, atol=5e-3, rtol=1e-3))

    # fused decode loop: seq2=11 with Tc=8 -> 2 time chunks + padded-tail masking
    seq2 = seq + 3
    xs = jax.random.normal(ks, (batch, seq2, input_feature_size), jnp.float32)
    outs_fused, h_fused = model.decode(xs, hidden)
    jax.block_until_ready((outs_fused, h_fused))
    assert outs_fused.shape == (batch, seq2, hidden_size)
    assert h_fused.shape == (1, batch, hidden_size)

    # self-consistency: fused chunked loop == iterated single-step calls
    h_it = hidden
    outs_it = []
    for t in range(seq2):
        o_t, h_it = model(xs[:, t:t + 1, :], h_it)
        outs_it.append(o_t[:, 0, :])
    outs_it = jnp.stack(outs_it, axis=1)
    assert bool(jnp.allclose(outs_it, outs_fused, atol=1e-3, rtol=1e-3))
    assert bool(jnp.allclose(h_it, h_fused, atol=1e-3, rtol=1e-3))

    print("KERNEL_OK")
</pallas_src>

<mosaic_0001>
module attributes {stable_mosaic.version = 11 : i64} {
  func.func @_gru_cell_kernel(%arg0: memref<8x8xf32, #tpu.memory_space<vmem>>, %arg1: memref<8x128xf32, #tpu.memory_space<vmem>>, %arg2: memref<8x384xf32, #tpu.memory_space<vmem>>, %arg3: memref<128x384xf32, #tpu.memory_space<vmem>>, %arg4: memref<1x384xf32, #tpu.memory_space<vmem>>, %arg5: memref<1x128xf32, #tpu.memory_space<vmem>>, %arg6: memref<8x128xf32, #tpu.memory_space<vmem>>) attributes {dimension_semantics = [], scalar_prefetch = 0 : i64, scratch_operands = 0 : i64, tpu.core_type = #tpu.core_type<tc>} {
    %c0 = arith.constant 0 : index
    %c0_0 = arith.constant 0 : index
    %0 = vector.load %arg0[%c0, %c0_0] : memref<8x8xf32, #tpu.memory_space<vmem>>, vector<8x8xf32>
    %c0_1 = arith.constant 0 : index
    %c0_2 = arith.constant 0 : index
    %1 = vector.load %arg2[%c0_1, %c0_2] : memref<8x384xf32, #tpu.memory_space<vmem>>, vector<8x384xf32>
    %cst = arith.constant dense<0.000000e+00> : vector<8x384xf32>
    %2 = tpu.matmul %0, %1, %cst {dimension_numbers = #tpu.dot_dimension_numbers<[1], [0], [0], [1], [0, 0, 1, 1], [], []>} : vector<8x8xf32>, vector<8x384xf32>, vector<8x384xf32> -> vector<8x384xf32>
    %c0_3 = arith.constant 0 : index
    %c0_4 = arith.constant 0 : index
    %3 = vector.load %arg4[%c0_3, %c0_4] : memref<1x384xf32, #tpu.memory_space<vmem>>, vector<1x384xf32>
    %4 = vector.broadcast %3 : vector<1x384xf32> to vector<8x384xf32>
    %5 = arith.addf %2, %4 : vector<8x384xf32>
    %c0_5 = arith.constant 0 : index
    %c0_6 = arith.constant 0 : index
    %6 = vector.load %arg1[%c0_5, %c0_6] : memref<8x128xf32, #tpu.memory_space<vmem>>, vector<8x128xf32>
    %c0_7 = arith.constant 0 : index
    %c0_8 = arith.constant 0 : index
    %7 = vector.load %arg3[%c0_7, %c0_8] : memref<128x384xf32, #tpu.memory_space<vmem>>, vector<128x384xf32>
    %cst_9 = arith.constant dense<0.000000e+00> : vector<8x384xf32>
    %8 = tpu.matmul %6, %7, %cst_9 {dimension_numbers = #tpu.dot_dimension_numbers<[1], [0], [0], [1], [0, 0, 1, 1], [], []>} : vector<8x128xf32>, vector<128x384xf32>, vector<8x384xf32> -> vector<8x384xf32>
    %9 = vector.extract_strided_slice %5 {offsets = [0, 0], sizes = [8, 128], strides = [1, 1]} : vector<8x384xf32> to vector<8x128xf32>
    %10 = vector.extract_strided_slice %8 {offsets = [0, 0], sizes = [8, 128], strides = [1, 1]} : vector<8x384xf32> to vector<8x128xf32>
    %11 = arith.addf %9, %10 : vector<8x128xf32>
    %12 = arith.negf %11 : vector<8x128xf32>
    %13 = math.exp %12 : vector<8x128xf32>
    %cst_10 = arith.constant 1.000000e+00 : f32
    %14 = vector.broadcast %cst_10 : f32 to vector<8x128xf32>
    %15 = arith.addf %14, %13 : vector<8x128xf32>
    %16 = arith.divf %14, %15 : vector<8x128xf32>
    %17 = vector.extract_strided_slice %5 {offsets = [0, 128], sizes = [8, 128], strides = [1, 1]} : vector<8x384xf32> to vector<8x128xf32>
    %18 = vector.extract_strided_slice %8 {offsets = [0, 128], sizes = [8, 128], strides = [1, 1]} : vector<8x384xf32> to vector<8x128xf32>
    %19 = arith.addf %17, %18 : vector<8x128xf32>
    %20 = arith.negf %19 : vector<8x128xf32>
    %21 = math.exp %20 : vector<8x128xf32>
    %cst_11 = arith.constant 1.000000e+00 : f32
    %22 = vector.broadcast %cst_11 : f32 to vector<8x128xf32>
    %23 = arith.addf %22, %21 : vector<8x128xf32>
    %24 = arith.divf %22, %23 : vector<8x128xf32>
    %25 = vector.extract_strided_slice %5 {offsets = [0, 256], sizes = [8, 128], strides = [1, 1]} : vector<8x384xf32> to vector<8x128xf32>
    %26 = vector.extract_strided_slice %8 {offsets = [0, 256], sizes = [8, 128], strides = [1, 1]} : vector<8x384xf32> to vector<8x128xf32>
    %c0_12 = arith.constant 0 : index
    %c0_13 = arith.constant 0 : index
    %27 = vector.load %arg5[%c0_12, %c0_13] : memref<1x128xf32, #tpu.memory_space<vmem>>, vector<1x128xf32>
    %28 = vector.broadcast %27 : vector<1x128xf32> to vector<8x128xf32>
    %29 = arith.addf %26, %28 : vector<8x128xf32>
    %30 = arith.mulf %16, %29 : vector<8x128xf32>
    %31 = arith.addf %25, %30 : vector<8x128xf32>
    %32 = math.tanh %31 : vector<8x128xf32>
    %cst_14 = arith.constant 1.000000e+00 : f32
    %33 = vector.broadcast %cst_14 : f32 to vector<8x128xf32>
    %34 = arith.subf %33, %24 : vector<8x128xf32>
    %35 = arith.mulf %34, %32 : vector<8x128xf32>
    %c0_15 = arith.constant 0 : index
    %c0_16 = arith.constant 0 : index
    %36 = vector.load %arg1[%c0_15, %c0_16] : memref<8x128xf32, #tpu.memory_space<vmem>>, vector<8x128xf32>
    %37 = arith.mulf %24, %36 : vector<8x128xf32>
    %38 = arith.addf %35, %37 : vector<8x128xf32>
    %c0_17 = arith.constant 0 : index
    %c0_18 = arith.constant 0 : index
    %39 = vector.load %arg6[%c0_17, %c0_18] : memref<8x128xf32, #tpu.memory_space<vmem>>, vector<8x128xf32>
    tpu.vector_store %arg6[%c0_17, %c0_18], %38 {strides = array<i32>} : memref<8x128xf32, #tpu.memory_space<vmem>>, vector<8x128xf32>,
    return
  }
}

</mosaic_0001>

<bundles_post_ra>
// kernel: tpu_custom_call.1
= control target key start
LH: loop header
LB: loop body
LE: loop exit
PB: predicated region body
PF: predicated region fallthrough
CT: control target
= control target key end

     0   :  { %11 = vsyncpa [#allocation3], 0  ;;  %s561_s0 = inlined_call_operand.hbm [shape: f32[8,8], index: 0, kind: input, shape index: {}]   ;;  %s562_s1 = inlined_call_operand.hbm [shape: f32[8,128], index: 1, kind: input, shape index: {}]   ;;  %s563_s2 = inlined_call_operand.hbm [shape: f32[8,384], index: 2, kind: input, shape index: {}]   ;;  %s564_s3 = inlined_call_operand.hbm [shape: f32[128,384], index: 3, kind: input, shape index: {}]   ;;  %s565_s4 = inlined_call_operand.vmem [shape: f32[1,384], index: 4, kind: input, shape index: {}]   ;;  %s566_s5 = inlined_call_operand.vmem [shape: f32[1,128], index: 5, kind: input, shape index: {}]   ;;  %s567_s6 = inlined_call_operand.hbm [shape: f32[8,128], index: 6, kind: output, shape index: {}]  }
   0x1   :  { %12 = vsyncpa [#allocation6], 0 }
   0x2   :  { %13 = vsyncpa [#allocation9], 0  ;;  %s31_s23 = sshll.u32 %s562_s1, 4  ;;  %s32_s23 = int_to_ptr.hbm [resolvable:$true] %s31_s23 }
   0x3   :  { %14 = vsyncpa [#allocation4], 0  ;;  %s489_s24 = smov [#allocation5]   ;;  %s20_s28 = sshll.u32 %s561_s0, 4  ;;  %s21_s28 = int_to_ptr.hbm [resolvable:$true] %s20_s28 }
   0x4   :  { %s33_s25 = sshll.u32 %s489_s24, 4  ;;  %s490_s29 = smov [#allocation2]   ;;  %s34_s25 = int_to_ptr.vmem [resolvable:$true] %s33_s25 }
   0x5   :  { %36 = dma.hbm_to_vmem [thread:$0]  %s32_s23, 128, %s34_s25, [#allocation6]  }
   0x6   :  { %s22_s30 = sshll.u32 %s490_s29, 4  ;;  %s42_s9 = sshll.u32 %s563_s2, 4  ;;  %s23_s30 = int_to_ptr.vmem [resolvable:$true] %s22_s30  ;;  %s43_s9 = int_to_ptr.hbm [resolvable:$true] %s42_s9 }
   0x7   :  { %25 = dma.hbm_to_vmem [thread:$0]  %s21_s28, 128, %s23_s30, [#allocation3]  }
   0x8   :  { %s52_s11 = sshll.u32 %s564_s3, 4  ;;  %s491_s12 = smov [#allocation7]   ;;  %s53_s11 = int_to_ptr.hbm [resolvable:$true] %s52_s11 }
   0x9   :  { %s44_s13 = sshll.u32 %s491_s12, 4  ;;  %s492_s0 = smov [#allocation8]   ;;  %s45_s13 = int_to_ptr.vmem [resolvable:$true] %s44_s13 }
   0xa   :  { %47 = dma.hbm_to_vmem [thread:$0]  %s43_s9, 384, %s45_s13, [#allocation6]  }
   0xb   :  { %s54_s14 = sshll.u32 %s492_s0, 4  ;;  %s493_s15 = smov 384   ;;  %s55_s14 = int_to_ptr.vmem [resolvable:$true] %s54_s14 }
   0xc   :  { %s494_s16 = smov 24  }
   0xd   :  { %60 = dma.hbm_to_vmem [thread:$0]  %s53_s11, 6144, %s55_s14, [#allocation9], %s493_s15, %s493_s15, %s494_s16  }
   0xe   :  { %481 = dma.done.wait [#allocation3], 128  }
   0xf   :  { %482 = vsyncadd [#allocation3], 4294967168 }
  0x10   :  { %483 = dma.done.wait [#allocation6], 512  }
  0x11   :  { %484 = vsyncadd [#allocation6], 4294966784 }
  0x12   :  { %485 = dma.done.wait [#allocation9], 6144  }
  0x13   :  { %486 = vsyncadd [#allocation9], 4294961152  ;;  %v203_v0 = vld [vmem:[#allocation8 + $0x168] sm:$0xff]  ;;  %v200_v1 = vld [vmem:[#allocation8 + $0x150] sm:$0xff]  ;;  %vm93_vm0 = vcmask 64512   ;;  %s326_s21 = sshll.u32 %s567_s6, 4  ;;  %s327_s21 = int_to_ptr.hbm [resolvable:$true] %s326_s21 }
  0x14   :  { %v204_v2 = vld [vmem:[#allocation8 + $0x170] sm:$0xff]  ;;  %206 = vmatpush.msra.mxu3 %v203_v0  ;;  %v201_v3 = vld [vmem:[#allocation8 + $0x158] sm:$0xff]  ;;  %v198_v5 = vld [vmem:[#allocation8 + $0x140] sm:$0xff] }
  0x15   :  { %226 = vmatpush.msra.mxu0 %v204_v2  ;;  %v197_v4 = vld [vmem:[#allocation8 + $0x138] sm:$0xff]  ;;  %v194_v6 = vld [vmem:[#allocation8 + $0x120] sm:$0xff]  ;;  %v195_v7 = vld [vmem:[#allocation8 + $0x128] sm:$0xff] }
  0x16   :  { %207 = vmatpush.msra.mxu3 %v200_v1  ;;  %v82_v8 = vld [vmem:[#allocation7] sm:$0xff]  ;;  %v192_v10 = vld [vmem:[#allocation8 + $0x110] sm:$0xff]  ;;  %v81_v11 = vld [vmem:[#allocation2] sm:$0xff] }
  0x17   :  { %227 = vmatpush.msra.mxu0 %v201_v3  ;;  %v191_v9 = vld [vmem:[#allocation8 + $0x108] sm:$0xff]  ;;  %112 = vmatpush.msra.mxu2 %v82_v8  ;;  %v188_v12 = vld [vmem:[#allocation8 + $0xf0] sm:$0xff]  ;;  %v189_v13 = vld [vmem:[#allocation8 + $0xf8] sm:$0xff] }
  0x18   :  { %208 = vmatpush.msra.mxu3 %v197_v4  ;;  %338 = vmatmul.msk.f32.vlgmr.msra.gmra.mxu2 %vm93_vm0, %v81_v11  ;;  %v83_v14 = vld [vmem:[#allocation7 + $0x8] sm:$0xff]  ;;  %v185_v15 = vld [vmem:[#allocation8 + $0xd8] sm:$0xff]  ;;  %v186_v16 = vld [vmem:[#allocation8 + $0xe0] sm:$0xff] }
  0x19   :  { %228 = vmatpush.msra.mxu0 %v198_v5  ;;  %132 = vmatpush.msrb.mxu2 %v83_v14  ;;  %v182_v17 = vld [vmem:[#allocation8 + $0xc0] sm:$0xff]  ;;  %v183_v18 = vld [vmem:[#allocation8 + $0xc8] sm:$0xff]  ;;  %v205_v19 = vld [vmem:[#allocation8 + $0x178] sm:$0xff] }
  0x1a   :  { %209 = vmatpush.msra.mxu3 %v194_v6  ;;  %v202_v20 = vld [vmem:[#allocation8 + $0x160] sm:$0xff]  ;;  %v179_v21 = vld [vmem:[#allocation8 + $0xa8] sm:$0xff]  ;;  %v180_v22 = vld [vmem:[#allocation8 + $0xb0] sm:$0xff]  ;;  %246 = vmatpush.msra.mxu1 %v205_v19 }
  0x1b   :  { %229 = vmatpush.msra.mxu0 %v195_v7  ;;  %v199_v23 = vld [vmem:[#allocation8 + $0x148] sm:$0xff]  ;;  %v84_v24 = vld [vmem:[#allocation7 + $0x10] sm:$0xff]  ;;  %v176_v25 = vld [vmem:[#allocation8 + $0x90] sm:$0xff] }
  0x1c   :  { %210 = vmatpush.msra.mxu3 %v191_v9  ;;  %v177_v26 = vld [vmem:[#allocation8 + $0x98] sm:$0xff]  ;;  %247 = vmatpush.msra.mxu1 %v202_v20  ;;  %v196_v27 = vld [vmem:[#allocation8 + $0x130] sm:$0xff]  ;;  %v174_v29 = vld [vmem:[#allocation8 + $0x80] sm:$0xff] }
  0x1d   :  { %230 = vmatpush.msra.mxu0 %v192_v10  ;;  %v173_v28 = vld [vmem:[#allocation8 + $0x78] sm:$0xff]  ;;  %152 = vmatpush.msra.mxu2 %v84_v24  ;;  %v170_v31 = vld [vmem:[#allocation8 + $0x60] sm:$0xff]  ;;  %v171_v32 = vld [vmem:[#allocation8 + $0x68] sm:$0xff] }
  0x1e   :  { %211 = vmatpush.msra.mxu3 %v188_v12  ;;  %248 = vmatpush.msra.mxu1 %v199_v23  ;;  %v193_v30 = vld [vmem:[#allocation8 + $0x118] sm:$0xff]  ;;  %v190_v33 = vld [vmem:[#allocation8 + $0x100] sm:$0xff]  ;;  %v167_v34 = vld [vmem:[#allocation8 + $0x48] sm:$0xff] }
  0x1f   :  { %231 = vmatpush.msra.mxu0 %v189_v13  ;;  %v168_v35 = vld [vmem:[#allocation8 + $0x50] sm:$0xff]  ;;  %v187_v36 = vld [vmem:[#allocation8 + $0xe8] sm:$0xff]  ;;  %v165_v38 = vld [vmem:[#allocation8 + $0x38] sm:$0xff] }
  0x20   :  { %212 = vmatpush.msra.mxu3 %v185_v15  ;;  %339 = vmatmul.msk.f32.vlgmr.msrb.gmra.mxu2 %vm93_vm0, %v81_v11  ;;  %v164_v37 = vld [vmem:[#allocation8 + $0x30] sm:$0xff]  ;;  %v161_v40 = vld [vmem:[#allocation8 + $0x18] sm:$0xff]  ;;  %v162_v41 = vld [vmem:[#allocation8 + $0x20] sm:$0xff] }
  0x21   :  { %232 = vmatpush.msra.mxu0 %v186_v16  ;;  %249 = vmatpush.msra.mxu1 %v196_v27  ;;  %v184_v39 = vld [vmem:[#allocation8 + $0xd0] sm:$0xff]  ;;  %v181_v42 = vld [vmem:[#allocation8 + $0xb8] sm:$0xff]  ;;  %v158_v43 = vld [vmem:[#allocation8] sm:$0xff] }
  0x22   :  { %213 = vmatpush.msra.mxu3 %v182_v17  ;;  %v159_v44 = vld [vmem:[#allocation8 + $0x8] sm:$0xff]  ;;  %v546_v45 = vld [vmem:[#allocation5] sm:$0xff]  ;;  %v172_v48 = vld [vmem:[#allocation8 + $0x70] sm:$0xff] }
  0x23   :  { %233 = vmatpush.msra.mxu0 %v183_v18  ;;  %250 = vmatpush.msra.mxu1 %v193_v30  ;;  %v178_v46 = vld [vmem:[#allocation8 + $0xa0] sm:$0xff]  ;;  %v175_v47 = vld [vmem:[#allocation8 + $0x88] sm:$0xff]  ;;  %v169_v49 = vld [vmem:[#allocation8 + $0x58] sm:$0xff] }
  0x24   :  { %214 = vmatpush.msra.mxu3 %v179_v21  ;;  %v166_v50 = vld [vmem:[#allocation8 + $0x40] sm:$0xff]  ;;  %v163_v51 = vld [vmem:[#allocation8 + $0x28] sm:$0xff]  ;;  %v160_v52 = vld [vmem:[#allocation8 + $0x10] sm:$0xff] }
  0x25   :  { %234 = vmatpush.msra.mxu0 %v180_v22  ;;  %251 = vmatpush.msra.mxu1 %v190_v33  ;;  %v85_v54 = vld [vmem:[%s565_s4] sm:$0x7] }
  0x26   :  { %215 = vmatpush.msra.mxu3 %v176_v25  ;;  %v88_v55 = vperm.slane %v85_v54, 1  ;;  %v87_v58 = vperm.slane %v85_v54, 0  ;;  %v350_v12 = vld [vmem:[%s566_s5] ss:$0 sm:$0xff]  ;;  %v89_v17 = vperm.slane %v85_v54, 2  ;;  %s495_s5 = smov [#allocation10]  }
  0x27   :  { %235 = vmatpush.msra.mxu0 %v177_v26  ;;  %252 = vmatpush.msra.mxu1 %v187_v36  ;;  %s324_s18 = sshll.u32 %s495_s5, 4  ;;  %s325_s18 = int_to_ptr.vmem [resolvable:$true] %s324_s18 }
  0x28   :  { %216 = vmatpush.msra.mxu3 %v173_v28  ;;  %340 = vmatmul.msk.f32.vlgmr.msra.gmra.mxu2 %vm93_vm0, %v81_v11 }
  0x29   :  { %236 = vmatpush.msra.mxu0 %v174_v29  ;;  %253 = vmatpush.msra.mxu1 %v184_v39 }
  0x2a   :  { %217 = vmatpush.msra.mxu3 %v170_v31 }
  0x2b   :  { %237 = vmatpush.msra.mxu0 %v171_v32  ;;  %254 = vmatpush.msra.mxu1 %v181_v42 }
  0x2c   :  { %218 = vmatpush.msra.mxu3 %v167_v34 }
  0x2d   :  { %238 = vmatpush.msra.mxu0 %v168_v35  ;;  %255 = vmatpush.msra.mxu1 %v178_v46 }
  0x2e   :  { %219 = vmatpush.msra.mxu3 %v164_v37 }
  0x2f   :  { %239 = vmatpush.msra.mxu0 %v165_v38  ;;  %256 = vmatpush.msra.mxu1 %v175_v47 }
  0x30   :  { %220 = vmatpush.msra.mxu3 %v161_v40 }
  0x31   :  { %240 = vmatpush.msra.mxu0 %v162_v41  ;;  %257 = vmatpush.msra.mxu1 %v172_v48 }
  0x32   :  { %221 = vmatpush.msra.mxu3 %v158_v43 }
  0x33   :  { %241 = vmatpush.msra.mxu0 %v159_v44  ;;  %222 = vmatmul.f32.vlgmr.msra.gmra.mxu3 %v546_v45 }
  0x34   :  { %242 = vmatmul.f32.vlgmr.msra.gmra.mxu0 %v546_v45  ;;  %258 = vmatpush.msra.mxu1 %v169_v49 }
  0x36   :  { %259 = vmatpush.msra.mxu1 %v166_v50 }
  0x38   :  { %260 = vmatpush.msra.mxu1 %v163_v51 }
  0x3a   :  { %261 = vmatpush.msra.mxu1 %v160_v52 }
  0x3b   :  { %262 = vmatmul.f32.vlgmr.msra.gmra.mxu1 %v546_v45 }
  0x9b   :  { %v114_v53 = vpop.f32.mrf.mxu2 }
  0x9c   :  { %v115_v61 = vadd.f32 %v114_v53, %v87_v58 }
  0xa3   :  { %v134_v56 = vpop.f32.mrf.mxu2 }
  0xa4   :  { %v135_v57 = vadd.f32 %v134_v56, %v88_v55 }
  0xab   :  { %v154_v18 = vpop.f32.mrf.mxu2 }
  0xac   :  { %v155_v24 = vadd.f32 %v154_v18, %v89_v17 }
  0xb1   :  { %v243_v59 = vpop.f32.mrf.mxu0 }
  0xb2   :  { %v286_v60 = vadd.f32 %v243_v59, %v135_v57 }
  0xb4   :  { %v342_v62 = vmul.f32 -1.442695, %v286_v60 }
  0xb6   :  { %351 = vpow2.f32 %v342_v62  ;;  %v223_v63 = vpop.f32.mrf.mxu3 }
  0xb7   :  { %v266_v0 = vadd.f32 %v223_v63, %v115_v61 }
  0xb8   :  { %v263_v13 = vpop.f32.mrf.mxu1 }
  0xb9   :  { %v341_v1 = vmul.f32 -1.442695, %v266_v0  ;;  %v310_v21 = vadd.f32 %v350_v12, %v263_v13 }
  0xbb   :  { %353 = vpow2.f32 %v341_v1 }
  0xbc   :  { %v352_v2 = vpop.eup %351 }
  0xbd   :  { %v290_v3 = vadd.f32 1.0, %v352_v2 }
  0xbf   :  { %355 = vrcp.f32 %v290_v3  ;;  %vm296_vm4 = vweird.f32 %v290_v3  ;;  %v302_v25 = vand.u32 2147483648, %v290_v3  ;;  %v300_v28 = vand.u32 2147483647, %v290_v3 }
  0xc1   :  { %v354_v4 = vpop.eup %353  ;;  %v303_v31 = vor.u32 1.1754944e-38, %v302_v25  ;;  %vm301_vm8 = vcmp.eq.f32.partialorder %v300_v28, 8.507059e+37 }
  0xc2   :  { %v270_v5 = vadd.f32 1.0, %v354_v4 }
  0xc4   :  { %357 = vrcp.f32 %v270_v5  ;;  %v282_v14 = vand.u32 2147483648, %v270_v5  ;;  %v280_v16 = vand.u32 2147483647, %v270_v5  ;;  %vm276_vm2 = vweird.f32 %v270_v5 }
  0xc5   :  { %v356_v6 = vpop.eup %355 }
  0xc6   :  { %v292_v7 = vmul.f32 %v356_v6, %v290_v3  ;;  %v283_v22 = vor.u32 1.1754944e-38, %v282_v14  ;;  %vm297_vm5 = vweird.f32 %v356_v6  ;;  %vm281_vm6 = vcmp.eq.f32.partialorder %v280_v16, 8.507059e+37 }
  0xc7   :  { %vm298_vm7 = vmor %vm296_vm4, %vm297_vm5 }
  0xc8   :  { %v293_v10 = vsub.f32 1.0, %v292_v7 }
  0xca   :  { %v358_v8 = vpop.eup %357  ;;  %v294_v19 = vmul.f32 %v356_v6, %v293_v10 }
  0xcb   :  { %v272_v9 = vmul.f32 %v358_v8, %v270_v5  ;;  %vm277_vm1 = vweird.f32 %v358_v8 }
  0xcc   :  { %vm278_vm3 = vmor %vm276_vm2, %vm277_vm1  ;;  %v295_v27 = vadd.f32 %v356_v6, %v294_v19 }
  0xcd   :  { %v273_v11 = vsub.f32 1.0, %v272_v9 }
  0xce   :  { %v299_v32 = vsel %vm298_vm7, %v356_v6, %v295_v27 }
  0xcf   :  { %v274_v15 = vmul.f32 %v358_v8, %v273_v11  ;;  %v304_v33 = vsel %vm301_vm8, %v303_v31, %v299_v32 }
  0xd0   :  { %v314_v34 = vsub.f32 1.0, %v304_v33  ;;  %v316_v37 = vmul.f32 %v304_v33, %v546_v45 }
  0xd1   :  { %v275_v20 = vadd.f32 %v358_v8, %v274_v15 }
  0xd3   :  { %v279_v23 = vsel %vm278_vm3, %v358_v8, %v275_v20 }
  0xd4   :  { %v284_v26 = vsel %vm281_vm6, %v283_v22, %v279_v23 }
  0xd5   :  { %v311_v29 = vmul.f32 %v310_v21, %v284_v26 }
  0xd7   :  { %v312_v30 = vadd.f32 %v311_v29, %v155_v24 }
  0xd9   :  { %359 = vtanh.f32 %v312_v30 }
  0xdf   :  { %v360_v35 = vpop.eup %359 }
  0xe0   :  { %v315_v36 = vmul.f32 %v360_v35, %v314_v34 }
  0xe2   :  { %v317_v38 = vadd.f32 %v316_v37, %v315_v36 }
  0xe4   :  { %318 = vst [vmem:[#allocation10] sm:$0xff] %v317_v38 }
  0xe5   :  { %329 = dma.vmem_to_hbm [thread:$0]  %s325_s18, 128, %s327_s21, [#allocation4]  }
  0xe6   :  { %487 = dma.done.wait [#allocation4], 128  }
  0xe7   :  { %488 = vsyncadd [#allocation4], 4294967168 }
  0xe8   :  { %334 = vsyncpa [#allocation3], 1 }
  0xe9   :  { %335 = vsyncpa [#allocation6], 1 }
  0xea   :  { %336 = vsyncpa [#allocation9], 1 }
  0xeb   :  { %337 = vsyncpa [#allocation4], 1 }

</bundles_post_ra>
